<compile_context>
chip_gen: v5e
topology: v5e:2x2
jax: 0.10.0
libtpu: 0.0.40
codegen_flags: <defaults>
</compile_context>

<pallas_src>
import functools

import jax
import jax.numpy as jnp
from jax import lax
from jax.experimental import pallas as pl
from jax.experimental.pallas import tpu as pltpu

ALPHA = 1.0
GAMMA = 2        # integer power -> exact square, matches torch gamma=2
BETA = 1.0
EPS = 1e-7


# --------------------------------------------------------------------------------------
# pltpu.roll direction probe (run once, outside jit): we need "shift toward higher lane
# index"; rolling by d in one convention equals rolling by (Pb - d) in the other, so a
# tiny one-off probe makes the scan robust to either convention.
# --------------------------------------------------------------------------------------
_ROLL_TOWARD_HIGHER = None


def _roll_probe_kernel(x_ref, o_ref):
    o_ref[...] = pltpu.roll(x_ref[...], shift=1, axis=1)


def _roll_shifts_toward_higher():
    global _ROLL_TOWARD_HIGHER
    if _ROLL_TOWARD_HIGHER is None:
        x = jnp.arange(8 * 128, dtype=jnp.float32).reshape(8, 128)
        y = pl.pallas_call(
            _roll_probe_kernel,
            out_shape=jax.ShapeDtypeStruct((8, 128), jnp.float32),
        )(x)
        # jnp.roll-style (toward higher index): y[0,1] == x[0,0] == 0
        _ROLL_TOWARD_HIGHER = bool(jax.device_get(y)[0, 1] == 0.0)
    return _ROLL_TOWARD_HIGHER


# --------------------------------------------------------------------------------------
# Kernel: one grid step processes a (C, Pb) lane-block of pixels.
# --------------------------------------------------------------------------------------
def _focal_lovasz_kernel(gts_ref, x_ref, t_ref, ef_ref, out_ref,
                         carry_ref, facc_ref, lacc_ref, *, inv_p, roll_forward):
    C, Pb = x_ref.shape
    i = pl.program_id(0)

    @pl.when(i == 0)
    def _init():
        carry_ref[...] = jnp.zeros_like(carry_ref)
        facc_ref[...] = jnp.zeros_like(facc_ref)
        lacc_ref[...] = jnp.zeros_like(lacc_ref)

    # ---------------- focal loss (softmax / CE / modulation; VPU + EUP) ----------------
    x = x_ref[...]                                             # (C, Pb) raw logits
    t = t_ref[...]                                             # (1, Pb) int32, -1 on padding
    cls = lax.broadcasted_iota(jnp.int32, (C, Pb), 0)
    oh = (cls == t).astype(jnp.float32)                        # one-hot rebuilt in-kernel
    m = jnp.max(x, axis=0, keepdims=True)                      # (1, Pb)
    s = jnp.sum(jnp.exp(x - m), axis=0, keepdims=True)         # (1, Pb)
    logp = (x - m) - jnp.log(s)                                # log_softmax over classes
    ce = -jnp.sum(oh * logp, axis=0, keepdims=True)            # (1, Pb); exactly 0 on padding
    pt = jnp.clip(jnp.exp(-ce), EPS, 1.0 - EPS)                # == clamp(softmax)[target]
    omp = 1.0 - pt
    facc_ref[...] += jnp.sum(ALPHA * ce * (omp * omp), axis=1, keepdims=True)  # gamma == 2

    # ---------------- lovasz-softmax (on raw logits, as the module does) ----------------
    packed = ef_ref[...]                                       # (C, Pb) |err| with fg flag in sign bit
    fgs = jnp.where(pltpu.bitcast(packed, jnp.int32) < 0,      # sign bit (handles -0.0) -> fg
                    jnp.float32(1.0), jnp.float32(0.0))
    errs = jnp.abs(packed)                                     # sorted desc, 0 on padding
    gts = gts_ref[...]                                         # (C, 1) total fg count per class

    lane = lax.broadcasted_iota(jnp.int32, (C, Pb), 1)

    # Intra-block inclusive prefix sum along lanes: Hillis-Steele log-step scan.
    # Exact: all partial sums are small integers (< 2^24) in f32.
    local = fgs
    d = 1
    while d < Pb:
        amt = d if roll_forward else Pb - d
        shifted = pltpu.roll(local, shift=amt, axis=1)
        local = local + jnp.where(lane >= d, shifted, 0.0)
        d *= 2

    carry = carry_ref[...]                                     # prefix of all prior blocks
    csum = carry + local                                       # global inclusive cumsum
    carry_ref[...] = carry + jnp.sum(fgs, axis=1, keepdims=True)

    cnt = (i * Pb + 1 + lane).astype(jnp.float32)              # global 1-based position
    inter = gts - csum
    union = inter + cnt                                        # == gts + (cnt - csum)
    union_prev = union - 1.0 + fgs                             # union at previous global position
    # grad = jac - jac_prev collapsed to a single fraction:
    #   grad = (inter + cnt*fg) / (union * union_prev); at global j==0 it equals jac[0].
    # union_prev == 0 only for an absent class at global j==0 (masked by `present` anyway).
    denom = union * jnp.where(union_prev == 0.0, jnp.float32(1.0), union_prev)
    grad = (inter + cnt * fgs) / denom                         # == lovasz_grad(fg_sorted)

    present = (gts > 0.0).astype(jnp.float32)                  # classes='present'
    lacc_ref[...] += jnp.sum(errs * grad * present, axis=(0, 1), keepdims=True)

    @pl.when(i == pl.num_programs(0) - 1)
    def _finish():
        npres = jnp.sum(present, axis=(0, 1), keepdims=True)   # (1, 1)
        lov = jnp.where(npres > 0.0,
                        lacc_ref[...] / jnp.maximum(npres, 1.0),
                        jnp.zeros_like(npres))
        out_ref[...] = (facc_ref[...] * inv_p + BETA * lov) / (1.0 + BETA)


# --------------------------------------------------------------------------------------
# Wrapper
# --------------------------------------------------------------------------------------
@functools.partial(jax.jit, static_argnames=("block_p", "roll_forward"))
def _focal_lovasz_impl(logits, targets, *, block_p, roll_forward):
    B, C, H, W = logits.shape
    P = B * H * W

    # class-major flatten, pixel order p = b*H*W + h*W + w (matches flatten_probas order)
    x_cp = jnp.transpose(logits.astype(jnp.float32), (1, 0, 2, 3)).reshape(C, P)
    t = targets.reshape(P).astype(jnp.int32)
    oh = jnp.arange(C, dtype=jnp.int32)[:, None] == t[None, :]
    oh_f = oh.astype(jnp.float32)
    gts = jnp.sum(oh_f, axis=1, keepdims=True)                  # (C, 1) total fg per class

    errs = jnp.abs(oh_f - x_cp)   # per-class |fg - class_pred| (raw logits, as in the module)
    # Pack the 0/1 fg flag into the (always clear: errs >= 0) sign bit -> one kernel stream.
    packed_bits = lax.bitcast_convert_type(errs, jnp.uint32) | (oh.astype(jnp.uint32) << 31)
    packed = lax.bitcast_convert_type(packed_bits, jnp.float32)
    # TODO(synk): torch.sort(descending) has no TPU Pallas primitive; the per-class sort stays
    # in XLA (one sort_key_val carrying the packed payload) -- everything downstream runs in
    # the kernel.  Tie reordering among equal errors cannot change the lovasz sum.
    _, packed_sorted = lax.sort_key_val(-errs, packed, dimension=1)

    n_blk = -(-P // block_p)
    P_pad = n_blk * block_p
    pad = P_pad - P
    if pad:
        # padded tail: packed=+0.0 (fg=0, err=0 -> no lovasz contribution),
        #              target=-1 (ce==0 -> no focal contribution)
        x_cp = jnp.pad(x_cp, ((0, 0), (0, pad)))
        t = jnp.pad(t, (0, pad), constant_values=-1)
        packed_sorted = jnp.pad(packed_sorted, ((0, 0), (0, pad)))
    t_2d = t.reshape(1, P_pad)

    kernel = functools.partial(_focal_lovasz_kernel,
                               inv_p=float(1.0 / P),
                               roll_forward=roll_forward)

    log2_bp = max(1, (block_p - 1).bit_length())
    cost = pl.CostEstimate(
        flops=int(C * P_pad * (25 + 3 * log2_bp)),
        transcendentals=int(2 * C * P_pad + 2 * P_pad),          # exp/log + per-class divide
        bytes_accessed=int(2 * C * P_pad * 4 + P_pad * 4 + C * 4 + 4),
    )

    out = pl.pallas_call(
        kernel,
        out_shape=jax.ShapeDtypeStruct((1, 1), jnp.float32),
        grid_spec=pltpu.PrefetchScalarGridSpec(
            num_scalar_prefetch=0,
            grid=(n_blk,),
            in_specs=[
                pl.BlockSpec((C, 1), lambda i: (0, 0)),          # gts (resident, tiny)
                pl.BlockSpec((C, block_p), lambda i: (0, i)),    # logits (f32)
                pl.BlockSpec((1, block_p), lambda i: (0, i)),    # targets (int32)
                pl.BlockSpec((C, block_p), lambda i: (0, i)),    # packed sorted errs+fg (f32)
            ],
            out_specs=pl.BlockSpec((1, 1), lambda i: (0, 0)),
            scratch_shapes=[
                pltpu.VMEM((C, 1), jnp.float32),   # running cross-block cumsum carry
                pltpu.VMEM((1, 1), jnp.float32),   # focal partial sum
                pltpu.VMEM((1, 1), jnp.float32),   # lovasz partial sum
            ],
        ),
        compiler_params=pltpu.CompilerParams(
            dimension_semantics=("arbitrary",),    # serial carry + accumulators
            vmem_limit_bytes=32 * 1024 * 1024,     # safe on v5e/v6e/v7x; footprint ~1 MiB
        ),
        cost_estimate=cost,
    )(gts, x_cp, t_2d, packed_sorted)
    return out[0, 0]


def focal_lovasz_loss(logits, targets, block_p=None):
    """logits: (B, C, H, W) float32; targets: (B, H, W) int. Returns scalar loss."""
    B, C, H, W = logits.shape
    P = B * H * W
    if block_p is None:
        # lane-dense block; bytes/step stay far under per-generation scoped VMEM
        # (v5e 16 MiB default, v6e/v7x 32 MiB) even with double-buffering.
        block_p = min(8192, -(-P // 128) * 128)
    block_p = max(128, -(-int(block_p) // 128) * 128)
    return _focal_lovasz_impl(logits, targets, block_p=block_p,
                              roll_forward=_roll_shifts_toward_higher())


# --------------------------------------------------------------------------------------
# Pure-JAX reference of the same semantics (for verification)
# --------------------------------------------------------------------------------------
def _reference(logits, targets):
    B, C, H, W = logits.shape
    x = jnp.transpose(logits, (0, 2, 3, 1)).reshape(-1, C)
    t = targets.reshape(-1)
    logp = jax.nn.log_softmax(x, axis=1)
    p = jnp.clip(jax.nn.softmax(x, axis=1), EPS, 1.0 - EPS)
    ce = -jnp.take_along_axis(logp, t[:, None], axis=1)[:, 0]
    pt = jnp.take_along_axis(p, t[:, None], axis=1)[:, 0]
    focal = jnp.mean(ALPHA * ce * (1.0 - pt) ** GAMMA)
    losses, present = [], []
    for c in range(C):
        fg = (t == c).astype(jnp.float32)
        err = jnp.abs(fg - x[:, c])
        order = jnp.argsort(-err)
        es, fs = err[order], fg[order]
        gts = fs.sum()
        inter = gts - jnp.cumsum(fs)
        union = gts + jnp.cumsum(1.0 - fs)
        jac = 1.0 - inter / union
        grad = jnp.concatenate([jac[:1], jac[1:] - jac[:-1]])
        losses.append(jnp.sum(es * grad))
        present.append(gts > 0)
    losses = jnp.stack(losses)
    present = jnp.stack(present).astype(jnp.float32)
    lov = jnp.where(present.sum() > 0, jnp.sum(losses * present) / present.sum(), 0.0)
    return (focal + BETA * lov) / (1.0 + BETA)


if __name__ == "__main__":
    key = jax.random.PRNGKey(0)
    k1, k2 = jax.random.split(key)
    B, C, H, W = 2, 4, 16, 16
    logits = jax.random.normal(k1, (B, C, H, W), dtype=jnp.float32)
    targets = jax.random.randint(k2, (B, H, W), 0, C, dtype=jnp.int32)

    # small block so the demo exercises multiple grid steps + the cross-block carry
    out = focal_lovasz_loss(logits, targets, block_p=128)
    out = jax.block_until_ready(out)

    ref = _reference(logits, targets)
    assert bool(jnp.isfinite(out)), out
    assert jnp.allclose(out, ref, rtol=1e-4, atol=1e-4), (out, ref)
    print("KERNEL_OK")
</pallas_src>

<mosaic_0001>
module attributes {stable_mosaic.version = 11 : i64} {
  func.func @_roll_probe_kernel(%arg0: memref<8x128xf32, #tpu.memory_space<vmem>>, %arg1: memref<8x128xf32, #tpu.memory_space<vmem>>) attributes {dimension_semantics = [], scalar_prefetch = 0 : i64, scratch_operands = 0 : i64, tpu.core_type = #tpu.core_type<tc>} {
    %c0 = arith.constant 0 : index
    %c0_0 = arith.constant 0 : index
    %0 = vector.load %arg0[%c0, %c0_0] : memref<8x128xf32, #tpu.memory_space<vmem>>, vector<8x128xf32>
    %c1_i32 = arith.constant 1 : i32
    %1 = tpu.dynamic_rotate %0 by %c1_i32 dim 1 : vector<8x128xf32>, i32 -> vector<8x128xf32>
    %c0_1 = arith.constant 0 : index
    %c0_2 = arith.constant 0 : index
    %2 = vector.load %arg1[%c0_1, %c0_2] : memref<8x128xf32, #tpu.memory_space<vmem>>, vector<8x128xf32>
    tpu.vector_store %arg1[%c0_1, %c0_2], %1 {strides = array<i32>} : memref<8x128xf32, #tpu.memory_space<vmem>>, vector<8x128xf32>,
    return
  }
}

</mosaic_0001>

<bundles_post_ra>
// kernel: tpu_custom_call.1
= control target key start
LH: loop header
LB: loop body
LE: loop exit
PB: predicated region body
PF: predicated region fallthrough
CT: control target
= control target key end

     0   :  { %6 = vsyncpa [#allocation3], 0  ;;  %s118_s0 = inlined_call_operand.hbm [shape: f32[8,128], index: 0, kind: input, shape index: {}]   ;;  %s119_s1 = inlined_call_operand.hbm [shape: f32[8,128], index: 1, kind: output, shape index: {}]  }
   0x1   :  { %7 = vsyncpa [#allocation4], 0  ;;  %s13_s8 = sshll.u32 %s118_s0, 4  ;;  %s99_s9 = smov [#allocation2]   ;;  %s14_s8 = int_to_ptr.hbm [resolvable:$true] %s13_s8 }
   0x2   :  { %s15_s10 = sshll.u32 %s99_s9, 4  ;;  %s16_s10 = int_to_ptr.vmem [resolvable:$true] %s15_s10 }
   0x3   :  { %18 = dma.hbm_to_vmem [thread:$0]  %s14_s8, 128, %s16_s10, [#allocation3]  }
   0x4   :  { %95 = dma.done.wait [#allocation3], 128  }
   0x5   :  { %96 = vsyncadd [#allocation3], 4294967168  ;;  %v23_v0 = vld [vmem:[#allocation2] sm:$0xff]  ;;  %s100_s11 = smov 1   ;;  %s101_s12 = smov [#allocation5]  }
   0x6   :  { %24 = vrot.lane.b32.xlu0 %v23_v0, %s100_s11  ;;  %s32_s13 = sshll.u32 %s101_s12, 4  ;;  %s34_s16 = sshll.u32 %s119_s1, 4  ;;  %s33_s13 = int_to_ptr.vmem [resolvable:$true] %s32_s13  ;;  %s35_s16 = int_to_ptr.hbm [resolvable:$true] %s34_s16 }
  0x78   :  { %v25_v1 = vpop.permute.xlu0 %24 }
  0x79   :  { %26 = vst [vmem:[#allocation5] sm:$0xff] %v25_v1 }
  0x7a   :  { %37 = dma.vmem_to_hbm [thread:$0]  %s33_s13, 128, %s35_s16, [#allocation4]  }
  0x7b   :  { %97 = dma.done.wait [#allocation4], 128  }
  0x7c   :  { %98 = vsyncadd [#allocation4], 4294967168 }
  0x7d   :  { %42 = vsyncpa [#allocation3], 1 }
  0x7e   :  { %43 = vsyncpa [#allocation4], 1 }

</bundles_post_ra>
